<compile_context>
chip_gen: v6e
topology: v6e:2x2x1
jax: 0.10.0
libtpu: 0.0.40
codegen_flags: <defaults>
</compile_context>

<pallas_src>
from functools import partial

import jax
import jax.numpy as jnp
from jax.experimental import pallas as pl
from jax.experimental.pallas import tpu as pltpu

_LANE = 128
_SUB = 8
_MAX_TILE_ROWS = 1024   # 1024x128 f32 = 512 KiB/plane; fused step ~4.5 MiB


# ---------------------------------------------------------------------------
# Planning / layout helpers (run under jit in the wrappers)
# ---------------------------------------------------------------------------
def _plan(n, max_tile_rows=_MAX_TILE_ROWS):
    """Pick (rows_pad, tile_rows, steps) so rows_pad tracks rows tightly.

    rows_pad = steps * tile_rows >= rows, overshoot < 8 * steps rows.
    """
    rows = max(1, pl.cdiv(n, _LANE))
    steps = pl.cdiv(rows, max_tile_rows)
    tile_rows = pl.cdiv(pl.cdiv(rows, steps), _SUB) * _SUB
    rows_pad = steps * tile_rows
    return rows_pad, tile_rows, steps


def _planar_to_blocks(planar, rows_pad, pad_value):
    """(4, N) planar boxes -> (4, rows_pad, 128) float32.

    Zero-copy (pure reshape) when N == rows_pad * 128; otherwise one fused
    pad copy (no transpose).
    """
    n = planar.shape[1]
    n_pad = rows_pad * _LANE
    p = planar.astype(jnp.float32)
    if n_pad != n:
        p = jnp.pad(p, ((0, 0), (0, n_pad - n)), constant_values=pad_value)
    return p.reshape(4, rows_pad, _LANE)


def _rows_from_vec(vec, rows_pad, pad_value):
    """(N,) -> (rows_pad, 128) float32 (zero-copy when already aligned)."""
    n = vec.shape[0]
    n_pad = rows_pad * _LANE
    v = vec.astype(jnp.float32)
    if n_pad != n:
        v = jnp.pad(v, (0, n_pad - n), constant_values=pad_value)
    return v.reshape(rows_pad, _LANE)


# ---------------------------------------------------------------------------
# Shared in-kernel math
# ---------------------------------------------------------------------------
def _iou_terms(p_l, p_t, p_r, p_b, t_l, t_t, t_r, t_b, iou_loss_type, approx):
    """Per-element ious / gious / dious on (tile_rows, 128) slabs.

    `approx=True` routes the divides to the EUP via pl.reciprocal (hot path);
    `approx=False` keeps exact division (module-compat helpers).
    """
    target_area = (t_l + t_r) * (t_t + t_b)
    pred_area = (p_l + p_r) * (p_t + p_b)
    w_intersect = jnp.minimum(p_l, t_l) + jnp.minimum(p_r, t_r)
    h_intersect = jnp.minimum(p_b, t_b) + jnp.minimum(p_t, t_t)
    area_intersect = w_intersect * h_intersect
    area_union = target_area + pred_area - area_intersect
    # NOTE: like the reference, no clamp on raw regression values; if inputs
    # can be negative, (area_union + 1) <= 0 makes the 'iou' log NaN upstream
    # too.
    if approx:
        ious = (area_intersect + 1.0) * pl.reciprocal(area_union + 1.0,
                                                      approx=True)
    else:
        ious = (area_intersect + 1.0) / (area_union + 1.0)

    if iou_loss_type in ("iou", "linear_iou"):
        return ious

    if iou_loss_type == "giou":
        g_w_intersect = jnp.maximum(p_l, t_l) + jnp.maximum(p_r, t_r)
        g_h_intersect = jnp.maximum(p_b, t_b) + jnp.maximum(p_t, t_t)
        ac_union = g_w_intersect * g_h_intersect + 1e-07
        if approx:
            gious = ious - (ac_union - area_union) * pl.reciprocal(
                ac_union, approx=True)
        else:
            gious = ious - (ac_union - area_union) / ac_union
        return jnp.clip(gious, -1.0, 1.0)

    if iou_loss_type == "diou":
        pred_cx = (p_l + p_r) * 0.5
        pred_cy = (p_t + p_b) * 0.5
        target_cx = (t_l + t_r) * 0.5
        # NOTE: reproduces the upstream fcos_core bug (t_l, not t_t).
        target_cy = (t_l + t_b) * 0.5
        g_w_intersect = jnp.maximum(p_l, t_l) + jnp.maximum(p_r, t_r)
        g_h_intersect = jnp.maximum(p_b, t_b) + jnp.maximum(p_t, t_t)
        inter_diag = (pred_cx - target_cx) ** 2 + (pred_cy - target_cy) ** 2
        outer_diag = g_w_intersect ** 2 + g_h_intersect ** 2
        # NOTE: no epsilon on outer_diag, matching the reference.
        if approx:
            dious = ious - inter_diag * pl.reciprocal(outer_diag, approx=True)
        else:
            dious = ious - inter_diag / outer_diag
        return jnp.clip(dious, -1.0, 1.0)

    raise NotImplementedError(iou_loss_type)


def _losses_from_ious(ious, iou_loss_type):
    if iou_loss_type == "iou":
        return -jnp.log(ious)
    return 1.0 - ious   # linear_iou / giou / diou


# ---------------------------------------------------------------------------
# Kernel bodies
# ---------------------------------------------------------------------------
def _fused_sum_kernel(pred_ref, target_ref, w_ref, out_ref, acc_ref, *,
                      iou_loss_type):
    """pred/target planar (4, T, 128), weight (T, 128) -> (8,128) partials."""
    step = pl.program_id(0)

    @pl.when(step == 0)
    def _():
        acc_ref[...] = jnp.zeros_like(acc_ref)

    ious = _iou_terms(pred_ref[0], pred_ref[1], pred_ref[2], pred_ref[3],
                      target_ref[0], target_ref[1], target_ref[2],
                      target_ref[3], iou_loss_type, approx=True)
    lw = _losses_from_ious(ious, iou_loss_type) * w_ref[...]
    # VPU-only partial reduce into a resident (8,128) accumulator; the tiny
    # final cross-lane reduce stays in the (jitted) wrapper.
    acc_ref[...] += jnp.sum(lw.reshape(-1, _SUB, _LANE), axis=0)

    @pl.when(step == pl.num_programs(0) - 1)
    def _():
        out_ref[...] = acc_ref[...]


def _calc_ious_kernel(pred_ref, target_ref, out_ref, *, iou_loss_type):
    out_ref[...] = _iou_terms(pred_ref[0], pred_ref[1], pred_ref[2],
                              pred_ref[3], target_ref[0], target_ref[1],
                              target_ref[2], target_ref[3], iou_loss_type,
                              approx=False)


def _forward_sum_kernel(ious_ref, w_ref, out_ref, acc_ref, *, iou_loss_type):
    step = pl.program_id(0)

    @pl.when(step == 0)
    def _():
        acc_ref[...] = jnp.zeros_like(acc_ref)

    lw = _losses_from_ious(ious_ref[...], iou_loss_type) * w_ref[...]
    acc_ref[...] += jnp.sum(lw.reshape(-1, _SUB, _LANE), axis=0)

    @pl.when(step == pl.num_programs(0) - 1)
    def _():
        out_ref[...] = acc_ref[...]


def _forward_origin_kernel(ious_ref, out_ref, *, iou_loss_type):
    out_ref[...] = _losses_from_ious(ious_ref[...], iou_loss_type)


# ---------------------------------------------------------------------------
# Wrappers
# ---------------------------------------------------------------------------
def _check_type(iou_loss_type):
    if iou_loss_type not in ("iou", "linear_iou", "giou", "diou"):
        raise NotImplementedError(iou_loss_type)


@partial(jax.jit, static_argnames=("iou_loss_type",))
def iou_loss_fused_planar(pred_planar, target_planar, weight, *,
                          iou_loss_type="iou"):
    """Fused calc_ious + forward(reduction='sum') on planar (4, N) boxes.

    Recommended training hot path: no transpose; when N is already aligned to
    the tile granularity the wrapper does zero data movement.
    """
    _check_type(iou_loss_type)
    n = pred_planar.shape[1]
    rows_pad, tile_rows, steps = _plan(n)

    # pad boxes with 1.0 -> ious = 1 on padded lanes (finite); weight padded
    # with 0.0 so padding never contributes to the sum.
    pred_b = _planar_to_blocks(pred_planar, rows_pad, pad_value=1.0)
    target_b = _planar_to_blocks(target_planar, rows_pad, pad_value=1.0)
    w_b = _rows_from_vec(weight, rows_pad, pad_value=0.0)

    box_spec = pl.BlockSpec((4, tile_rows, _LANE), lambda i: (0, i, 0))
    vec_spec = pl.BlockSpec((tile_rows, _LANE), lambda i: (i, 0))

    partials = pl.pallas_call(
        partial(_fused_sum_kernel, iou_loss_type=iou_loss_type),
        out_shape=jax.ShapeDtypeStruct((_SUB, _LANE), jnp.float32),
        grid=(steps,),
        in_specs=[box_spec, box_spec, vec_spec],
        out_specs=pl.BlockSpec((_SUB, _LANE), lambda i: (0, 0)),
        scratch_shapes=[pltpu.VMEM((_SUB, _LANE), jnp.float32)],
        compiler_params=pltpu.CompilerParams(
            dimension_semantics=("arbitrary",),
            allow_input_fusion=[True, True, True]),
    )(pred_b, target_b, w_b)
    # tiny final cross-lane reduce (8x128 elements) stays in XLA.
    return jnp.sum(partials)


@partial(jax.jit, static_argnames=("iou_loss_type",))
def iou_loss_fused(pred, target, weight, *, iou_loss_type="iou"):
    """Module-native interface: pred/target (N, 4) [l, t, r, b], weight (N,).

    Pays one fused pad+transpose copy per box tensor to reach the planar
    layout; prefer `iou_loss_fused_planar` when the producer can emit (4, N).
    """
    _check_type(iou_loss_type)
    return iou_loss_fused_planar(pred.astype(jnp.float32).T,
                                 target.astype(jnp.float32).T,
                                 weight, iou_loss_type=iou_loss_type)


@partial(jax.jit, static_argnames=("iou_loss_type",))
def calc_ious(pred, target, *, iou_loss_type="iou"):
    """pred, target: (N, 4) [l, t, r, b]; returns (N,) ious (module helper)."""
    _check_type(iou_loss_type)
    n = pred.shape[0]
    rows_pad, tile_rows, steps = _plan(n)
    pred_b = _planar_to_blocks(pred.astype(jnp.float32).T, rows_pad, 1.0)
    target_b = _planar_to_blocks(target.astype(jnp.float32).T, rows_pad, 1.0)

    out = pl.pallas_call(
        partial(_calc_ious_kernel, iou_loss_type=iou_loss_type),
        out_shape=jax.ShapeDtypeStruct((rows_pad, _LANE), jnp.float32),
        grid=(steps,),
        in_specs=[pl.BlockSpec((4, tile_rows, _LANE), lambda i: (0, i, 0)),
                  pl.BlockSpec((4, tile_rows, _LANE), lambda i: (0, i, 0))],
        out_specs=pl.BlockSpec((tile_rows, _LANE), lambda i: (i, 0)),
        compiler_params=pltpu.CompilerParams(
            dimension_semantics=("parallel",),
            allow_input_fusion=[True, True]),
    )(pred_b, target_b)
    return out.reshape(-1)[:n]


@partial(jax.jit, static_argnames=("iou_loss_type", "reduction"))
def iou_loss_forward(ious, weight=None, *, iou_loss_type="iou",
                     reduction="sum"):
    """Replicates IOULoss.forward on precomputed ious (module-compat path)."""
    _check_type(iou_loss_type)
    n = ious.shape[0]

    if reduction == "origin":
        rows_pad, tile_rows, steps = _plan(n)
        ious_2d = _rows_from_vec(ious, rows_pad, pad_value=1.0)
        out = pl.pallas_call(
            partial(_forward_origin_kernel, iou_loss_type=iou_loss_type),
            out_shape=jax.ShapeDtypeStruct((rows_pad, _LANE), jnp.float32),
            grid=(steps,),
            in_specs=[pl.BlockSpec((tile_rows, _LANE), lambda i: (i, 0))],
            out_specs=pl.BlockSpec((tile_rows, _LANE), lambda i: (i, 0)),
            compiler_params=pltpu.CompilerParams(
                dimension_semantics=("parallel",),
                allow_input_fusion=[True]),
        )(ious_2d)
        return out.reshape(-1)[:n]

    if reduction != "sum":
        raise NotImplementedError(reduction)
    assert weight is not None  # reference asserts False when weight is None

    rows_pad, tile_rows, steps = _plan(n)
    ious_2d = _rows_from_vec(ious, rows_pad, pad_value=1.0)   # -log(1)=0, 1-1=0
    w_2d = _rows_from_vec(weight, rows_pad, pad_value=0.0)
    vec_spec = pl.BlockSpec((tile_rows, _LANE), lambda i: (i, 0))

    partials = pl.pallas_call(
        partial(_forward_sum_kernel, iou_loss_type=iou_loss_type),
        out_shape=jax.ShapeDtypeStruct((_SUB, _LANE), jnp.float32),
        grid=(steps,),
        in_specs=[vec_spec, vec_spec],
        out_specs=pl.BlockSpec((_SUB, _LANE), lambda i: (0, 0)),
        scratch_shapes=[pltpu.VMEM((_SUB, _LANE), jnp.float32)],
        compiler_params=pltpu.CompilerParams(
            dimension_semantics=("arbitrary",),
            allow_input_fusion=[True, True]),
    )(ious_2d, w_2d)
    return jnp.sum(partials)


# ---------------------------------------------------------------------------
# Pure-JAX reference (mirrors the PyTorch module) for verification.
# ---------------------------------------------------------------------------
def _ref_calc_ious(pred, target, iou_loss_type):
    p_l, p_t, p_r, p_b = pred[:, 0], pred[:, 1], pred[:, 2], pred[:, 3]
    t_l, t_t, t_r, t_b = target[:, 0], target[:, 1], target[:, 2], target[:, 3]
    pred_cx = (p_l + p_r) / 2
    pred_cy = (p_t + p_b) / 2
    target_cx = (t_l + t_r) / 2
    target_cy = (t_l + t_b) / 2
    target_area = (t_l + t_r) * (t_t + t_b)
    pred_area = (p_l + p_r) * (p_t + p_b)
    w_int = jnp.minimum(p_l, t_l) + jnp.minimum(p_r, t_r)
    g_w = jnp.maximum(p_l, t_l) + jnp.maximum(p_r, t_r)
    inter_diag = (pred_cx - target_cx) ** 2 + (pred_cy - target_cy) ** 2
    h_int = jnp.minimum(p_b, t_b) + jnp.minimum(p_t, t_t)
    g_h = jnp.maximum(p_b, t_b) + jnp.maximum(p_t, t_t)
    outer_diag = g_w ** 2 + g_h ** 2
    ac_union = g_w * g_h + 1e-07
    area_int = w_int * h_int
    area_union = target_area + pred_area - area_int
    ious = (area_int + 1.0) / (area_union + 1.0)
    if iou_loss_type in ("iou", "linear_iou"):
        return ious
    if iou_loss_type == "giou":
        return jnp.clip(ious - (ac_union - area_union) / ac_union, -1.0, 1.0)
    return jnp.clip(ious - inter_diag / outer_diag, -1.0, 1.0)


def _ref_forward(ious, weight, iou_loss_type):
    losses = -jnp.log(ious) if iou_loss_type == "iou" else 1.0 - ious
    return jnp.sum(losses * weight)


if __name__ == "__main__":
    key = jax.random.PRNGKey(0)
    k1, k2, k3 = jax.random.split(key, 3)
    N = 200
    # l/t/r/b distance-regression targets are positive by construction.
    pred = jax.random.uniform(k1, (N, 4), jnp.float32, minval=0.5, maxval=5.0)
    target = jax.random.uniform(k2, (N, 4), jnp.float32, minval=0.5, maxval=5.0)
    weight = jax.random.uniform(k3, (N,), jnp.float32, minval=0.1, maxval=1.0)
    # planar (4, N) layout the hot path expects from the producing op.
    pred_planar = pred.T
    target_planar = target.T

    ok = True
    for loss_type in ("iou", "linear_iou", "giou", "diou"):
        ious_ref = _ref_calc_ious(pred, target, loss_type)
        loss_ref = _ref_forward(ious_ref, weight, loss_type)

        # fused hot path (approx EUP reciprocal -> slightly looser tolerance)
        loss_pl = iou_loss_fused_planar(pred_planar, target_planar, weight,
                                        iou_loss_type=loss_type)
        jax.block_until_ready(loss_pl)
        ok &= bool(jnp.allclose(loss_pl, loss_ref, rtol=2e-2, atol=2e-2))

        # module-native (N, 4) fused interface
        loss_f = iou_loss_fused(pred, target, weight, iou_loss_type=loss_type)
        jax.block_until_ready(loss_f)
        ok &= bool(jnp.allclose(loss_f, loss_ref, rtol=2e-2, atol=2e-2))

        # module-equivalent two-step path (exact math) -- tight tolerances
        ious = calc_ious(pred, target, iou_loss_type=loss_type)
        loss = iou_loss_forward(ious, weight, iou_loss_type=loss_type,
                                reduction="sum")
        jax.block_until_ready(loss)
        ok &= bool(jnp.allclose(ious, ious_ref, rtol=1e-5, atol=1e-5))
        ok &= bool(jnp.allclose(loss, loss_ref, rtol=1e-4, atol=1e-4))

    # reduction='origin'
    ious = calc_ious(pred, target, iou_loss_type="iou")
    losses = iou_loss_forward(ious, None, iou_loss_type="iou",
                              reduction="origin")
    jax.block_until_ready(losses)
    ok &= bool(jnp.allclose(losses,
                            -jnp.log(_ref_calc_ious(pred, target, "iou")),
                            rtol=1e-5, atol=1e-5))

    print("KERNEL_OK" if ok else "KERNEL_MISMATCH")
</pallas_src>

<mosaic_0001>
module attributes {stable_mosaic.version = 11 : i64} {
  func.func @_fused_sum_kernel(%arg0: i32, %arg1: memref<4x8x128xf32, #tpu.memory_space<vmem>>, %arg2: memref<4x8x128xf32, #tpu.memory_space<vmem>>, %arg3: memref<8x128xf32, #tpu.memory_space<vmem>>, %arg4: memref<8x128xf32, #tpu.memory_space<vmem>>, %arg5: memref<8x128xf32, #tpu.memory_space<vmem>>) attributes {dimension_semantics = [#tpu.dimension_semantics<arbitrary>], iteration_bounds = array<i64: 1>, scalar_prefetch = 0 : i64, scratch_operands = 1 : i64, tpu.core_type = #tpu.core_type<tc>, window_params = [{transform_indices = @transform_0, window_bounds = array<i64: 4, 8, 128>}, {transform_indices = @transform_1, window_bounds = array<i64: 4, 8, 128>}, {transform_indices = @transform_2, window_bounds = array<i64: 8, 128>}, {pipeline_mode = #tpu.pipeline_mode<synchronous>, transform_indices = @transform_3, window_bounds = array<i64: 8, 128>}]} {
    %c0_i32 = arith.constant 0 : i32
    %0 = arith.cmpi eq, %arg0, %c0_i32 : i32
    %1 = arith.extui %0 : i1 to i32
    %c0_i32_0 = arith.constant 0 : i32
    %2 = arith.cmpi ne, %1, %c0_i32_0 : i32
    scf.if %2 {
      %cst_32 = arith.constant 0.000000e+00 : f32
      %53 = vector.broadcast %cst_32 : f32 to vector<8x128xf32>
      %c0_33 = arith.constant 0 : index
      %c0_34 = arith.constant 0 : index
      %54 = vector.load %arg5[%c0_33, %c0_34] : memref<8x128xf32, #tpu.memory_space<vmem>>, vector<8x128xf32>
      tpu.vector_store %arg5[%c0_33, %c0_34], %53 {strides = array<i32>} : memref<8x128xf32, #tpu.memory_space<vmem>>, vector<8x128xf32>,
    } else {
    }
    %c0 = arith.constant 0 : index
    %c0_1 = arith.constant 0 : index
    %c0_2 = arith.constant 0 : index
    %3 = vector.load %arg1[%c0, %c0_1, %c0_2] : memref<4x8x128xf32, #tpu.memory_space<vmem>>, vector<1x8x128xf32>
    %4 = vector.shape_cast %3 : vector<1x8x128xf32> to vector<8x128xf32>
    %c1 = arith.constant 1 : index
    %c0_3 = arith.constant 0 : index
    %c0_4 = arith.constant 0 : index
    %5 = vector.load %arg1[%c1, %c0_3, %c0_4] : memref<4x8x128xf32, #tpu.memory_space<vmem>>, vector<1x8x128xf32>
    %6 = vector.shape_cast %5 : vector<1x8x128xf32> to vector<8x128xf32>
    %c2 = arith.constant 2 : index
    %c0_5 = arith.constant 0 : index
    %c0_6 = arith.constant 0 : index
    %7 = vector.load %arg1[%c2, %c0_5, %c0_6] : memref<4x8x128xf32, #tpu.memory_space<vmem>>, vector<1x8x128xf32>
    %8 = vector.shape_cast %7 : vector<1x8x128xf32> to vector<8x128xf32>
    %c3 = arith.constant 3 : index
    %c0_7 = arith.constant 0 : index
    %c0_8 = arith.constant 0 : index
    %9 = vector.load %arg1[%c3, %c0_7, %c0_8] : memref<4x8x128xf32, #tpu.memory_space<vmem>>, vector<1x8x128xf32>
    %10 = vector.shape_cast %9 : vector<1x8x128xf32> to vector<8x128xf32>
    %c0_9 = arith.constant 0 : index
    %c0_10 = arith.constant 0 : index
    %c0_11 = arith.constant 0 : index
    %11 = vector.load %arg2[%c0_9, %c0_10, %c0_11] : memref<4x8x128xf32, #tpu.memory_space<vmem>>, vector<1x8x128xf32>
    %12 = vector.shape_cast %11 : vector<1x8x128xf32> to vector<8x128xf32>
    %c1_12 = arith.constant 1 : index
    %c0_13 = arith.constant 0 : index
    %c0_14 = arith.constant 0 : index
    %13 = vector.load %arg2[%c1_12, %c0_13, %c0_14] : memref<4x8x128xf32, #tpu.memory_space<vmem>>, vector<1x8x128xf32>
    %14 = vector.shape_cast %13 : vector<1x8x128xf32> to vector<8x128xf32>
    %c2_15 = arith.constant 2 : index
    %c0_16 = arith.constant 0 : index
    %c0_17 = arith.constant 0 : index
    %15 = vector.load %arg2[%c2_15, %c0_16, %c0_17] : memref<4x8x128xf32, #tpu.memory_space<vmem>>, vector<1x8x128xf32>
    %16 = vector.shape_cast %15 : vector<1x8x128xf32> to vector<8x128xf32>
    %c3_18 = arith.constant 3 : index
    %c0_19 = arith.constant 0 : index
    %c0_20 = arith.constant 0 : index
    %17 = vector.load %arg2[%c3_18, %c0_19, %c0_20] : memref<4x8x128xf32, #tpu.memory_space<vmem>>, vector<1x8x128xf32>
    %18 = vector.shape_cast %17 : vector<1x8x128xf32> to vector<8x128xf32>
    %19 = arith.addf %12, %16 : vector<8x128xf32>
    %20 = arith.addf %14, %18 : vector<8x128xf32>
    %21 = arith.mulf %19, %20 : vector<8x128xf32>
    %22 = arith.addf %4, %8 : vector<8x128xf32>
    %23 = arith.addf %6, %10 : vector<8x128xf32>
    %24 = arith.mulf %22, %23 : vector<8x128xf32>
    %25 = arith.minimumf %4, %12 : vector<8x128xf32>
    %26 = arith.minimumf %8, %16 : vector<8x128xf32>
    %27 = arith.addf %25, %26 : vector<8x128xf32>
    %28 = arith.minimumf %10, %18 : vector<8x128xf32>
    %29 = arith.minimumf %6, %14 : vector<8x128xf32>
    %30 = arith.addf %28, %29 : vector<8x128xf32>
    %31 = arith.mulf %27, %30 : vector<8x128xf32>
    %32 = arith.addf %21, %24 : vector<8x128xf32>
    %33 = arith.subf %32, %31 : vector<8x128xf32>
    %cst = arith.constant 1.000000e+00 : f32
    %34 = vector.broadcast %cst : f32 to vector<8x128xf32>
    %35 = arith.addf %31, %34 : vector<8x128xf32>
    %cst_21 = arith.constant 1.000000e+00 : f32
    %36 = vector.broadcast %cst_21 : f32 to vector<8x128xf32>
    %37 = arith.addf %33, %36 : vector<8x128xf32>
    %38 = tpu.reciprocal %37 {approx = true} : vector<8x128xf32> -> vector<8x128xf32>
    %39 = arith.mulf %35, %38 : vector<8x128xf32>
    %40 = math.log %39 : vector<8x128xf32>
    %cst_22 = arith.constant 0.000000e+00 : f32
    %41 = vector.broadcast %cst_22 : f32 to vector<8x128xf32>
    %42 = arith.subf %41, %40 : vector<8x128xf32>
    %c0_23 = arith.constant 0 : index
    %c0_24 = arith.constant 0 : index
    %43 = vector.load %arg3[%c0_23, %c0_24] : memref<8x128xf32, #tpu.memory_space<vmem>>, vector<8x128xf32>
    %44 = arith.mulf %42, %43 : vector<8x128xf32>
    %c0_25 = arith.constant 0 : index
    %c0_26 = arith.constant 0 : index
    %45 = vector.load %arg5[%c0_25, %c0_26] : memref<8x128xf32, #tpu.memory_space<vmem>>, vector<8x128xf32>
    %46 = vector.shape_cast %44 : vector<8x128xf32> to vector<1x8x128xf32>
    %cst_27 = arith.constant dense<0.000000e+00> : vector<8x128xf32>
    %47 = vector.multi_reduction <add>, %46, %cst_27 [0] : vector<1x8x128xf32> to vector<8x128xf32>
    %48 = arith.addf %45, %47 : vector<8x128xf32>
    %c0_28 = arith.constant 0 : index
    %c0_29 = arith.constant 0 : index
    %49 = vector.load %arg5[%c0_28, %c0_29] : memref<8x128xf32, #tpu.memory_space<vmem>>, vector<8x128xf32>
    tpu.vector_store %arg5[%c0_28, %c0_29], %48 {strides = array<i32>} : memref<8x128xf32, #tpu.memory_space<vmem>>, vector<8x128xf32>,
    %c0_i32_30 = arith.constant 0 : i32
    %50 = arith.cmpi eq, %arg0, %c0_i32_30 : i32
    %51 = arith.extui %50 : i1 to i32
    %c0_i32_31 = arith.constant 0 : i32
    %52 = arith.cmpi ne, %51, %c0_i32_31 : i32
    scf.if %52 {
      %c0_32 = arith.constant 0 : index
      %c0_33 = arith.constant 0 : index
      %53 = vector.load %arg5[%c0_32, %c0_33] : memref<8x128xf32, #tpu.memory_space<vmem>>, vector<8x128xf32>
      %c0_34 = arith.constant 0 : index
      %c0_35 = arith.constant 0 : index
      %54 = vector.load %arg4[%c0_34, %c0_35] : memref<8x128xf32, #tpu.memory_space<vmem>>, vector<8x128xf32>
      tpu.vector_store %arg4[%c0_34, %c0_35], %53 {strides = array<i32>} : memref<8x128xf32, #tpu.memory_space<vmem>>, vector<8x128xf32>,
    } else {
    }
    return
  }
  func.func @transform_0(%arg0: i32) -> (i32, i32, i32) {
    %c0_i32 = arith.constant 0 : i32
    %c0_i32_0 = arith.constant 0 : i32
    %c0_i32_1 = arith.constant 0 : i32
    return %c0_i32, %arg0, %c0_i32_0 : i32, i32, i32
  }
  func.func @transform_1(%arg0: i32) -> (i32, i32, i32) {
    %c0_i32 = arith.constant 0 : i32
    %c0_i32_0 = arith.constant 0 : i32
    %c0_i32_1 = arith.constant 0 : i32
    return %c0_i32, %arg0, %c0_i32_0 : i32, i32, i32
  }
  func.func @transform_2(%arg0: i32) -> (i32, i32) {
    %c0_i32 = arith.constant 0 : i32
    %c0_i32_0 = arith.constant 0 : i32
    return %arg0, %c0_i32 : i32, i32
  }
  func.func @transform_3(%arg0: i32) -> (i32, i32) {
    %c0_i32 = arith.constant 0 : i32
    %c0_i32_0 = arith.constant 0 : i32
    %c0_i32_1 = arith.constant 0 : i32
    return %c0_i32, %c0_i32_0 : i32, i32
  }
}

</mosaic_0001>

<bundles_post_ra>
// kernel: iou_loss_fused_planar.2
= control target key start
LH: loop header
LB: loop body
LE: loop exit
PB: predicated region body
PF: predicated region fallthrough
CT: control target
= control target key end

     0   :  { %v61_v28 = vlaneseq  ;;  %s192_s0 = inlined_call_operand.vmem [shape: f32[1,4,8,128], index: 0, kind: input, shape index: {}]   ;;  %s193_s1 = inlined_call_operand.vmem [shape: f32[1,4,8,128], index: 1, kind: input, shape index: {}]   ;;  %s194_s2 = inlined_call_operand.vmem [shape: f32[200], index: 2, kind: input, shape index: {}]   ;;  %s195_s3 = inlined_call_operand.<no memory space> [shape: f32[], index: 3, kind: input, shape index: {}]   ;;  %s196_s4 = inlined_call_operand.vmem [shape: f32[8,128], index: 4, kind: output, shape index: {}]  }
   0x1   :  { %v9_v0 = vstv %s195_s3  ;;  %v16_v1 = vld [vmem:[%s193_s1] sm:$0xff]  ;;  %v124_v2 = vld [vmem:[%s193_s1 + $0x8] sm:$0xff]  ;;  %v125_v3 = vld [vmem:[%s193_s1 + $0x10] sm:$0xff] }
   0x2   :  { %v126_v4 = vld [vmem:[%s193_s1 + $0x18] sm:$0xff]  ;;  %v38_v5 = vld [vmem:[%s192_s0] sm:$0xff]  ;;  %v127_v6 = vld [vmem:[%s192_s0 + $0x8] sm:$0xff]  ;;  %v90_v7 = vadd.f32 %v125_v3, %v16_v1  ;;  %vm63_vm0 = vcmp.lt.s32.totalorder %v61_v28, 200 }
   0x3   :  { %v128_v8 = vld [vmem:[%s192_s0 + $0x10] sm:$0xff]  ;;  %v129_v9 = vld [vmem:[%s192_s0 + $0x18] sm:$0xff]  ;;  %v91_v10 = vadd.f32 %v126_v4, %v124_v2  ;;  %v93_v11 = vmin.f32 %v16_v1, %v38_v5  ;;  %v97_v12 = vmin.f32 %v124_v2, %v127_v6  ;;  %v60_v29 = vld [vmem:[%s194_s2] sm:$0x3] }
   0x4   :  { %v87_v13 = vadd.f32 %v128_v8, %v38_v5  ;;  %v88_v14 = vadd.f32 %v129_v9, %v127_v6  ;;  %v94_v15 = vmin.f32 %v125_v3, %v128_v8  ;;  %v96_v17 = vmin.f32 %v126_v4, %v129_v9 }
   0x5   :  { %v92_v16 = vmul.f32 %v91_v10, %v90_v7  ;;  %v64_v32 = vsel %vm63_vm0, %v60_v29, %v9_v0 }
   0x6   :  { %v89_v18 = vmul.f32 %v88_v14, %v87_v13  ;;  %v95_v19 = vadd.f32 %v94_v15, %v93_v11  ;;  %v98_v20 = vadd.f32 %v97_v12, %v96_v17 }
   0x8   :  { %v100_v21 = vadd.f32 %v92_v16, %v89_v18  ;;  %v99_v22 = vmul.f32 %v98_v20, %v95_v19 }
   0xa   :  { %v101_v23 = vsub.f32 %v100_v21, %v99_v22  ;;  %v102_v25 = vadd.f32 1.0, %v99_v22 }
   0xc   :  { %v103_v24 = vadd.f32 1.0, %v101_v23 }
   0xe   :  { %130 = vrcp.f32 %v103_v24 }
  0x1b   :  { %v131_v26 = vpop.eup %130 }
  0x1c   :  { %v105_v27 = vmul.f32 %v131_v26, %v102_v25 }
  0x1e   :  { %132 = vlog2.f32 %v105_v27 }
  0x2b   :  { %v133_v30 = vpop.eup %132 }
  0x2c   :  { %v107_v31 = vmul.f32 0.6931472, %v133_v30 }
  0x2e   :  { %v108_v33 = vsub.f32 0.0, %v107_v31 }
  0x30   :  { %v110_v34 = vmul.f32 %v108_v33, %v64_v32 }
  0x32   :  { %119 = vst [vmem:[%s196_s4] sm:$0xff] %v110_v34 }

</bundles_post_ra>
